<compile_context>
chip_gen: v7x
topology: tpu7x:2x2x1
jax: 0.10.0
libtpu: 0.0.40
codegen_flags: <defaults>
</compile_context>

<pallas_src>
import functools

import jax
import jax.numpy as jnp
from jax import lax
from jax.experimental import pallas as pl
from jax.experimental.pallas import tpu as pltpu


# --------------------------------------------------------------------------
# In-kernel compute shared by both layouts.
# --------------------------------------------------------------------------
def _block_forward(x, w_all, w_res, bc, br, local_t, shifts, out_dtype):
    """One (C, T) block of the TCN residual block.

    x       : (C, T)       input block (T = lanes)
    w_all   : (C, A*C)     stacked conv weights, one (C, C) slab per active tap
    w_res   : (C, C)       1x1 residual weight
    bc, br  : (C, 1) f32   conv / residual biases
    local_t : (1, T) int32 time index within each sequence (for causal mask)
    shifts  : tuple[int]   causal shift of each active tap (matches w_all order)
    """
    taps = []
    for s in shifts:
        if s == 0:
            taps.append(x)
        else:
            # Causal shift: XLU roll + lane mask broadcast over channels.
            taps.append(
                jnp.where(local_t >= s, pltpu.roll(x, s, axis=1), 0).astype(x.dtype)
            )
    x_stack = taps[0] if len(taps) == 1 else jnp.concatenate(taps, axis=0)

    # Single fused MXU contraction over (taps x channels).
    conv = jnp.dot(w_all, x_stack, preferred_element_type=jnp.float32)
    conv = jnp.maximum(conv + bc, 0.0)          # bias + ReLU (causal conv path)
    # Dropout: identity (eval / deterministic mode).

    # 1x1 residual conv, computed after the conv path to shorten live ranges.
    res = jnp.dot(w_res, x, preferred_element_type=jnp.float32) + br
    return jnp.maximum(conv + res, 0.0).astype(out_dtype)


def _tcn_slab_kernel(x_ref, w_all_ref, w_res_ref, bc_ref, br_ref, o_ref,
                     *, shifts, seq_len):
    """Lane-folded layout: block is (C, Nb*L) with batch folded onto lanes."""
    x = x_ref[...]
    nbl = x.shape[1]
    pos = lax.broadcasted_iota(jnp.int32, (1, nbl), 1)
    if nbl == seq_len:
        local_t = pos                                   # single sequence / block
    elif seq_len & (seq_len - 1) == 0:
        local_t = pos & (seq_len - 1)                   # cheap power-of-two mod
    else:
        local_t = pos % seq_len
    o_ref[...] = _block_forward(x, w_all_ref[...], w_res_ref[...],
                                bc_ref[...], br_ref[...], local_t, shifts,
                                o_ref.dtype)


def _tcn_batched_kernel(x_ref, w_all_ref, w_res_ref, bc_ref, br_ref, o_ref,
                        *, shifts):
    """Lane-aligned layout: block is (Nb, C, L); small static unroll over Nb."""
    nb = x_ref.shape[0]
    l = x_ref.shape[2]
    w_all = w_all_ref[...]
    w_res = w_res_ref[...]
    bc = bc_ref[...]
    br = br_ref[...]
    t_idx = lax.broadcasted_iota(jnp.int32, (1, l), 1)
    for b in range(nb):                                  # small static unroll
        o_ref[b] = _block_forward(x_ref[b], w_all, w_res, bc, br, t_idx,
                                  shifts, o_ref.dtype)


# --------------------------------------------------------------------------
# Tiling / budgeting helpers (generation-aware).
# --------------------------------------------------------------------------
def _vmem_capacity_bytes():
    try:
        info = pltpu.get_tpu_info()
        for name in ("vmem_capacity_bytes", "vmem_size_bytes", "vmem_bytes"):
            cap = getattr(info, name, None)
            if cap:
                return int(cap)
    except Exception:
        pass
    return 64 * 1024 * 1024          # conservative default (v7x-sized VMEM)


def _round_up(x, m):
    return ((x + m - 1) // m) * m


def _pick_batch_block_fold(n, seq_len, channels, itemsize, kstack,
                           target_lanes, tile_budget_bytes):
    """Batch block Nb for the lane-folded (C, Nb*L) layout."""
    # x in/out (double buffered) + stacked taps + f32 conv/res temps, per lane.
    bytes_per_lane = channels * ((2 + 2 + kstack) * itemsize + 2 * 4)
    max_lanes = max(seq_len, tile_budget_bytes // max(bytes_per_lane, 1))
    # Legal blocks: divisor of n, lanes 128-aligned unless it is the full batch.
    cands = [nb for nb in range(1, n + 1)
             if n % nb == 0 and (nb == n or (nb * seq_len) % 128 == 0)]
    within = [nb for nb in cands if nb * seq_len <= max_lanes]
    pool = within if within else cands[:1]      # smallest legal block if over budget
    multi = [nb for nb in pool if n // nb >= 2] or pool   # keep >=2 grid steps (v7x)
    best = multi[0]
    for nb in multi:
        if nb * seq_len <= max(target_lanes, seq_len):
            best = max(best, nb)
    return best


def _pick_batch_block_batched(n, channels, seq_len, itemsize, kstack,
                              tile_budget_bytes, max_unroll=8):
    """Batch block Nb for the lane-aligned (Nb, C, L) layout."""
    per_elem = channels * seq_len * ((2 + 2 + kstack) * itemsize + 2 * 4)
    limit = max(1, tile_budget_bytes // max(per_elem, 1))
    limit = min(int(limit), max_unroll, n)
    best = 1
    for nb in range(1, limit + 1):
        if n % nb == 0:
            best = nb
    # Prefer a grid of >= 2 so both v7x TensorCores get work.
    if n > 1 and n // best < 2:
        for nb in range(best - 1, 0, -1):
            if n % nb == 0 and n // nb >= 2:
                best = nb
                break
    return best


# --------------------------------------------------------------------------
# Wrapper.
# --------------------------------------------------------------------------
def dilated_residual_block(x, w_conv, b_conv, w_res, b_res, *,
                           kernel_size, dilation, compute_dtype=None):
    """x: (N, C, L); w_conv: (C, C, K); b_conv: (C,); w_res: (C, C); b_res: (C,)."""
    n, c, l = x.shape
    k = kernel_size
    out_dtype = x.dtype
    cdt = jnp.dtype(compute_dtype) if compute_dtype is not None else x.dtype

    # ---- channel padding to a sublane multiple (keeps slices tile-aligned) ----
    cp = _round_up(c, 8)
    if cp != c:
        pc = cp - c
        x = jnp.pad(x, ((0, 0), (0, pc), (0, 0)))
        w_conv = jnp.pad(w_conv, ((0, pc), (0, pc), (0, 0)))
        b_conv = jnp.pad(b_conv, ((0, pc),))
        w_res = jnp.pad(w_res, ((0, pc), (0, pc)))
        b_res = jnp.pad(b_res, ((0, pc),))

    # ---- active taps (shift < L) and stacked conv weight ----------------------
    shifts_all = [(k - 1 - j) * dilation for j in range(k)]
    active = [j for j in range(k) if shifts_all[j] < l]
    shifts = tuple(shifts_all[j] for j in active)
    kstack = len(shifts)
    w_all = jnp.concatenate([w_conv[:, :, j] for j in active], axis=1).astype(cdt)
    w_res_m = w_res.astype(cdt)
    bc = b_conv.reshape(cp, 1).astype(jnp.float32)
    br = b_res.reshape(cp, 1).astype(jnp.float32)

    # ---- generation-aware VMEM budgeting --------------------------------------
    itemsize = jnp.dtype(cdt).itemsize
    cap = _vmem_capacity_bytes()
    tile_budget = cap // 4                       # leave room for double buffering
    vmem_limit = int(min(cap * 3 // 4, 96 * 1024 * 1024))
    target_lanes = 8192 if cap >= (100 << 20) else 4096

    compiler_params = pltpu.CompilerParams(
        dimension_semantics=("parallel",),
        vmem_limit_bytes=vmem_limit)

    weight_specs = [
        pl.BlockSpec((cp, kstack * cp), lambda i: (0, 0)),   # stacked conv taps
        pl.BlockSpec((cp, cp), lambda i: (0, 0)),            # 1x1 residual
        pl.BlockSpec((cp, 1), lambda i: (0, 0)),             # b_conv
        pl.BlockSpec((cp, 1), lambda i: (0, 0)),             # b_res
    ]

    if l % 128 == 0:
        # Already lane-dense: keep (N, C, L); no host-side transposes.
        nb = _pick_batch_block_batched(n, cp, l, itemsize, kstack, tile_budget)
        grid = (n // nb,)
        kernel = functools.partial(_tcn_batched_kernel, shifts=shifts)
        out = pl.pallas_call(
            kernel,
            out_shape=jax.ShapeDtypeStruct((n, cp, l), out_dtype),
            grid_spec=pltpu.PrefetchScalarGridSpec(
                num_scalar_prefetch=0, grid=grid,
                in_specs=[pl.BlockSpec((nb, cp, l), lambda i: (i, 0, 0))]
                         + weight_specs,
                out_specs=pl.BlockSpec((nb, cp, l), lambda i: (i, 0, 0))),
            compiler_params=compiler_params,
        )(x.astype(cdt), w_all, w_res_m, bc, br)
        return out[:, :c, :] if cp != c else out

    # General case: fold batch onto the lane axis -> (C, N*L) slab.
    x_slab = jnp.transpose(x, (1, 0, 2)).reshape(cp, n * l).astype(cdt)
    nb = _pick_batch_block_fold(n, l, cp, itemsize, kstack,
                                target_lanes, tile_budget)
    lanes = nb * l
    grid = (n // nb,)
    kernel = functools.partial(_tcn_slab_kernel, shifts=shifts, seq_len=l)
    out_slab = pl.pallas_call(
        kernel,
        out_shape=jax.ShapeDtypeStruct((cp, n * l), out_dtype),
        grid_spec=pltpu.PrefetchScalarGridSpec(
            num_scalar_prefetch=0, grid=grid,
            in_specs=[pl.BlockSpec((cp, lanes), lambda i: (0, i))]
                     + weight_specs,
            out_specs=pl.BlockSpec((cp, lanes), lambda i: (0, i))),
        compiler_params=compiler_params,
    )(x_slab, w_all, w_res_m, bc, br)

    out = jnp.transpose(out_slab.reshape(cp, n, l), (1, 0, 2))
    out = out[:, :c, :] if cp != c else out
    return out.astype(out_dtype)


# --------------------------------------------------------------------------
# Pure-JAX reference mirroring the PyTorch forward (eval mode).
# --------------------------------------------------------------------------
def _reference(x, w_conv, b_conv, w_res, b_res, *, kernel_size, dilation):
    pad = (kernel_size - 1) * dilation
    out = lax.conv_general_dilated(
        x, w_conv, window_strides=(1,), padding=[(pad, pad)],
        rhs_dilation=(dilation,),
        dimension_numbers=("NCH", "OIH", "NCH"))
    out = out[..., :x.shape[2]] + b_conv[None, :, None]
    out = jnp.maximum(out, 0.0)
    res = jnp.einsum("oc,ncl->nol", w_res, x) + b_res[None, :, None]
    return jnp.maximum(out + res, 0.0)


if __name__ == "__main__":
    key = jax.random.PRNGKey(0)

    def make_params(key, c, k):
        k1, k2, k3, k4 = jax.random.split(key, 4)
        w_conv = 0.1 * jax.random.normal(k1, (c, c, k), jnp.float32)
        b_conv = 0.1 * jax.random.normal(k2, (c,), jnp.float32)
        w_res = 0.1 * jax.random.normal(k3, (c, c), jnp.float32)
        b_res = 0.1 * jax.random.normal(k4, (c,), jnp.float32)
        return w_conv, b_conv, w_res, b_res

    configs = [
        # (N, C,  L,  K, dilation)
        (2, 8, 16, 3, 2),     # lane-folded path (L not a multiple of 128)
        (4, 8, 128, 3, 4),    # lane-aligned path: no host transposes, grid >= 2
        (2, 4, 16, 3, 8),     # channel padding + tap with shift >= L (dropped)
        (2, 8, 16, 1, 1),     # kernel_size == 1 (pointwise conv + residual)
    ]
    for idx, (n, c, l, k, d) in enumerate(configs):
        key, kx, kp = jax.random.split(key, 3)
        x = jax.random.normal(kx, (n, c, l), jnp.float32)
        w_conv, b_conv, w_res, b_res = make_params(kp, c, k)
        y = dilated_residual_block(x, w_conv, b_conv, w_res, b_res,
                                   kernel_size=k, dilation=d)
        y = jax.block_until_ready(y)
        y_ref = _reference(x, w_conv, b_conv, w_res, b_res,
                           kernel_size=k, dilation=d)
        assert y.shape == (n, c, l)
        assert jnp.allclose(y, y_ref, atol=1e-5, rtol=1e-5), \
            f"mismatch vs reference in config {idx}: {(n, c, l, k, d)}"

    print("KERNEL_OK")
</pallas_src>

<mosaic_0001>
module attributes {stable_mosaic.version = 11 : i64} {
  func.func @_tcn_slab_kernel(%arg0: i32, %arg1: memref<8x32xf32, #tpu.memory_space<vmem>>, %arg2: memref<8x24xf32, #tpu.memory_space<vmem>>, %arg3: memref<8x8xf32, #tpu.memory_space<vmem>>, %arg4: memref<8x1xf32, #tpu.memory_space<vmem>>, %arg5: memref<8x1xf32, #tpu.memory_space<vmem>>, %arg6: memref<8x32xf32, #tpu.memory_space<vmem>>) attributes {dimension_semantics = [#tpu.dimension_semantics<parallel>], iteration_bounds = array<i64: 1>, scalar_prefetch = 0 : i64, scratch_operands = 0 : i64, tpu.core_type = #tpu.core_type<tc>, window_params = [{transform_indices = @transform_0, window_bounds = array<i64: 8, 32>}, {pipeline_mode = #tpu.pipeline_mode<synchronous>, transform_indices = @transform_1, window_bounds = array<i64: 8, 24>}, {pipeline_mode = #tpu.pipeline_mode<synchronous>, transform_indices = @transform_2, window_bounds = array<i64: 8, 8>}, {pipeline_mode = #tpu.pipeline_mode<synchronous>, transform_indices = @transform_3, window_bounds = array<i64: 8, 1>}, {pipeline_mode = #tpu.pipeline_mode<synchronous>, transform_indices = @transform_4, window_bounds = array<i64: 8, 1>}, {transform_indices = @transform_5, window_bounds = array<i64: 8, 32>}]} {
    %c0 = arith.constant 0 : index
    %c0_0 = arith.constant 0 : index
    %0 = vector.load %arg1[%c0, %c0_0] : memref<8x32xf32, #tpu.memory_space<vmem>>, vector<8x32xf32>
    %1 = tpu.iota {dimensions = array<i32: 1>} : vector<1x32xi32>
    %c15_i32 = arith.constant 15 : i32
    %2 = vector.broadcast %c15_i32 : i32 to vector<1x32xi32>
    %3 = arith.andi %1, %2 : vector<1x32xi32>
    %c0_1 = arith.constant 0 : index
    %c0_2 = arith.constant 0 : index
    %4 = vector.load %arg2[%c0_1, %c0_2] : memref<8x24xf32, #tpu.memory_space<vmem>>, vector<8x24xf32>
    %c0_3 = arith.constant 0 : index
    %c0_4 = arith.constant 0 : index
    %5 = vector.load %arg3[%c0_3, %c0_4] : memref<8x8xf32, #tpu.memory_space<vmem>>, vector<8x8xf32>
    %c0_5 = arith.constant 0 : index
    %c0_6 = arith.constant 0 : index
    %6 = vector.load %arg4[%c0_5, %c0_6] : memref<8x1xf32, #tpu.memory_space<vmem>>, vector<8x1xf32>
    %c0_7 = arith.constant 0 : index
    %c0_8 = arith.constant 0 : index
    %7 = vector.load %arg5[%c0_7, %c0_8] : memref<8x1xf32, #tpu.memory_space<vmem>>, vector<8x1xf32>
    %c4_i32 = arith.constant 4 : i32
    %8 = vector.broadcast %c4_i32 : i32 to vector<1x32xi32>
    %9 = arith.cmpi sge, %3, %8 : vector<1x32xi32>
    %c4_i32_9 = arith.constant 4 : i32
    %10 = tpu.dynamic_rotate %0 by %c4_i32_9 dim 1 : vector<8x32xf32>, i32 -> vector<8x32xf32>
    %c0_i32 = arith.constant 0 : i32
    %11 = arith.sitofp %c0_i32 : i32 to f32
    %12 = vector.shape_cast %9 : vector<1x32xi1> to vector<1x32xi1>
    %13 = vector.broadcast %12 : vector<1x32xi1> to vector<8x32xi1>
    %14 = vector.broadcast %11 : f32 to vector<8x32xf32>
    %15 = arith.select %13, %10, %14 : vector<8x32xi1>, vector<8x32xf32>
    %c2_i32 = arith.constant 2 : i32
    %16 = vector.broadcast %c2_i32 : i32 to vector<1x32xi32>
    %17 = arith.cmpi sge, %3, %16 : vector<1x32xi32>
    %c2_i32_10 = arith.constant 2 : i32
    %18 = tpu.dynamic_rotate %0 by %c2_i32_10 dim 1 : vector<8x32xf32>, i32 -> vector<8x32xf32>
    %c0_i32_11 = arith.constant 0 : i32
    %19 = arith.sitofp %c0_i32_11 : i32 to f32
    %20 = vector.shape_cast %17 : vector<1x32xi1> to vector<1x32xi1>
    %21 = vector.broadcast %20 : vector<1x32xi1> to vector<8x32xi1>
    %22 = vector.broadcast %19 : f32 to vector<8x32xf32>
    %23 = arith.select %21, %18, %22 : vector<8x32xi1>, vector<8x32xf32>
    %24 = tpu.concatenate %15, %23, %0 in 0 : vector<8x32xf32>, vector<8x32xf32>, vector<8x32xf32> -> vector<24x32xf32>
    %cst = arith.constant dense<0.000000e+00> : vector<8x32xf32>
    %25 = tpu.matmul %4, %24, %cst {dimension_numbers = #tpu.dot_dimension_numbers<[1], [0], [0], [1], [0, 0, 1, 1], [], []>} : vector<8x24xf32>, vector<24x32xf32>, vector<8x32xf32> -> vector<8x32xf32>
    %26 = vector.broadcast %6 : vector<8x1xf32> to vector<8x32xf32>
    %27 = arith.addf %25, %26 : vector<8x32xf32>
    %cst_12 = arith.constant 0.000000e+00 : f32
    %28 = vector.broadcast %cst_12 : f32 to vector<8x32xf32>
    %29 = arith.maximumf %27, %28 : vector<8x32xf32>
    %cst_13 = arith.constant dense<0.000000e+00> : vector<8x32xf32>
    %30 = tpu.matmul %5, %0, %cst_13 {dimension_numbers = #tpu.dot_dimension_numbers<[1], [0], [0], [1], [0, 0, 1, 1], [], []>} : vector<8x8xf32>, vector<8x32xf32>, vector<8x32xf32> -> vector<8x32xf32>
    %31 = vector.broadcast %7 : vector<8x1xf32> to vector<8x32xf32>
    %32 = arith.addf %30, %31 : vector<8x32xf32>
    %33 = arith.addf %29, %32 : vector<8x32xf32>
    %cst_14 = arith.constant 0.000000e+00 : f32
    %34 = vector.broadcast %cst_14 : f32 to vector<8x32xf32>
    %35 = arith.maximumf %33, %34 : vector<8x32xf32>
    %c0_15 = arith.constant 0 : index
    %c0_16 = arith.constant 0 : index
    %36 = vector.load %arg6[%c0_15, %c0_16] : memref<8x32xf32, #tpu.memory_space<vmem>>, vector<8x32xf32>
    tpu.vector_store %arg6[%c0_15, %c0_16], %35 {strides = array<i32>} : memref<8x32xf32, #tpu.memory_space<vmem>>, vector<8x32xf32>,
    return
  }
  func.func @transform_0(%arg0: i32) -> (i32, i32) {
    %c0_i32 = arith.constant 0 : i32
    %c0_i32_0 = arith.constant 0 : i32
    return %c0_i32, %arg0 : i32, i32
  }
  func.func @transform_1(%arg0: i32) -> (i32, i32) {
    %c0_i32 = arith.constant 0 : i32
    %c0_i32_0 = arith.constant 0 : i32
    %c0_i32_1 = arith.constant 0 : i32
    return %c0_i32, %c0_i32_0 : i32, i32
  }
  func.func @transform_2(%arg0: i32) -> (i32, i32) {
    %c0_i32 = arith.constant 0 : i32
    %c0_i32_0 = arith.constant 0 : i32
    %c0_i32_1 = arith.constant 0 : i32
    return %c0_i32, %c0_i32_0 : i32, i32
  }
  func.func @transform_3(%arg0: i32) -> (i32, i32) {
    %c0_i32 = arith.constant 0 : i32
    %c0_i32_0 = arith.constant 0 : i32
    %c0_i32_1 = arith.constant 0 : i32
    return %c0_i32, %c0_i32_0 : i32, i32
  }
  func.func @transform_4(%arg0: i32) -> (i32, i32) {
    %c0_i32 = arith.constant 0 : i32
    %c0_i32_0 = arith.constant 0 : i32
    %c0_i32_1 = arith.constant 0 : i32
    return %c0_i32, %c0_i32_0 : i32, i32
  }
  func.func @transform_5(%arg0: i32) -> (i32, i32) {
    %c0_i32 = arith.constant 0 : i32
    %c0_i32_0 = arith.constant 0 : i32
    return %c0_i32, %arg0 : i32, i32
  }
}

</mosaic_0001>

<bundles_post_ra>
// kernel: tpu_custom_call.1
= control target key start
LH: loop header
LB: loop body
LE: loop exit
PB: predicated region body
PF: predicated region fallthrough
CT: control target
= control target key end

     0   :  { %s357_s0 = inlined_call_operand.vmem [shape: f32[8,32], index: 0, kind: input, shape index: {}]   ;;  %s358_s1 = inlined_call_operand.vmem [shape: f32[8,24], index: 1, kind: input, shape index: {}]   ;;  %s359_s2 = inlined_call_operand.vmem [shape: f32[8,8], index: 2, kind: input, shape index: {}]   ;;  %s360_s3 = inlined_call_operand.vmem [shape: f32[8,1], index: 3, kind: input, shape index: {}]   ;;  %s361_s4 = inlined_call_operand.vmem [shape: f32[8,1], index: 4, kind: input, shape index: {}]   ;;  %s362_s5 = inlined_call_operand.hbm [shape: f32[8,32], index: 5, kind: output, shape index: {}]  }
   0x1   :  { %v21_v0 = vld [vmem:[%s357_s0] sm:$0xff] }
   0x2   :  { %10 = vsyncpa [#allocation3], 0  ;;  %s290_s20 = smov 32   ;;  %vm30_vm0 = vcmask 1047808   ;;  %v291_v3 = vmov 0.0|0.0   ;;  %v292_v4 = vmov 0.0   ;;  %v22_v11 = vlaneseq }
   0x3   :  { %31 = vrot.lane.b32.xlu0 %v21_v0, %s290_s20  ;;  %252 = vmatprep.subr.bf16.mxu0 %v291_v3  ;;  %vm293_vm1 = vmmov 0   ;;  %v26_v6 = vld [vmem:[%s359_s2] sm:$0xff]  ;;  %vm136_vm2 = vcmask 64512   ;;  %v294_v9 = vmov 0   ;;  %s295_s24 = smov 100   ;;  %s296_s25 = smov 98  }
   0x4   :  { %247 = vmatprep.subr.mxu1 %v292_v4  ;;  %244 = vmatprep.mubr.msk.f32.mxu0 %vm293_vm1, %v292_v4  ;;  %v27_v7 = vld [vmem:[%s360_s3] sm:$0xff]  ;;  %v23_v12 = vand.u32 127, %v22_v11  ;;  %vm56_vm6 = vcmask 195584   ;;  %vm212_vm7 = vcmask 261120  }
   0x5   :  { %248 = vmatpush3.msra.mxu1 %v21_v0  ;;  %249 = vmatprep.mubr.msk.f32.mxu1 %vm293_vm1, %v292_v4  ;;  %v28_v10 = vld [vmem:[%s361_s4] sm:$0xff]  ;;  %s297_s4 = smov [#allocation2]  }
   0x6   :  { %250 = vmatmul.mubr.msk.f32.vlgmr.msra.gmra.mrb[0].mxu1 %vm136_vm2, %v26_v6  ;;  %264 = vset.pattern.permute.xlu0 %v294_v9  ;;  %v24_v13 = vand.u32 15, %v23_v12  ;;  %v25_v17 = vld [vmem:[%s358_s1] sm:$0xff]  ;;  %s220_s28 = sshll.u32 %s297_s4, 4  ;;  %s221_s28 = int_to_ptr.vmem [resolvable:$true] %s220_s28 }
   0x7   :  { %265 = vset.pattern.permute.xlu1 %v294_v9  ;;  %s266_s1 = scalar_lea.vmem %s221_s28, 128  ;;  %p271_p1 = scmp.lt.s32.totalorder %s221_s28, %s221_s28 }
   0x8   :  { %vm29_vm3 = vcmp.ge.s32.totalorder %v24_v13, 4  ;;  %vm44_vm4 = vcmp.ge.s32.totalorder %v24_v13, 2  ;;  %p267_p0 = scmp.ne.s32.totalorder %s221_s28, %s266_s1  ;;  %p272_p2 = scmp.lt.s32.totalorder %s266_s1, %s266_s1 }
   0x9   :  { %vm254_vm5 = vmpackc.low %vm44_vm4, %vm29_vm3 }
   0xa   :  { %p273_p3 = por %p272_p2, %p271_p1 }
   0xc   :  { %p274_p4 = pnand %p273_p3, %p267_p0 }
  0x75   :  { %v32_v1 = vpop.permute.xlu0 %31 }
  0x76   :  { %v33_v2 = vsel %vm30_vm0, %v32_v1, %v21_v0 }
  0x77   :  { %34 = vrot.lane.b32.xlu0 %v33_v2, %s290_s20 }
  0x7b   :  { %53 = vperm.xlu0 %264, %v27_v7  }
  0xd9   :  { %v206_v18 = vpop.f32.mrb[0].mxu1 }
  0xda   :  { %v251_v19 = vpop.f32.mrb[1].mxu1 }
  0xe9   :  { %v35_v5 = vpop.permute.xlu0 %34 }
  0xea   :  { %v36_v8 = vsel %vm30_vm0, %v35_v5, %v21_v0 }
  0xeb   :  { %40 = vrot.lane.b32.xlu1 %v36_v8, %s295_s24 }
  0xef   :  { %47 = vrot.lane.b32.xlu1 %v36_v8, %s296_s25 }
  0xf3   :  { %133 = vperm.xlu1 %265, %v28_v10  }
  0xfa   :  { %v54_v20 = vpop.permute.xlu0 %53 }
 0x15d   :  { %v41_v14 = vpop.permute.xlu1 %40 }
 0x161   :  { %v48_v15 = vpop.permute.xlu1 %47 }
 0x162   :  { %v253_v16 = vpack.c.bf16 %v48_v15, %v41_v14 }
 0x164   :  { %255 = vmatpush3.bf16.msk.msra.mxu0 %vm254_vm5, %v253_v16 }
 0x165   :  { %242 = vmatprep.subr.mxu0 %v292_v4 }
 0x168   :  { %243 = vmatpush3.msra.mxu0 %v21_v0 }
 0x169   :  { %245 = vmatmul.mubr.msk.f32.vlgmr.msra.gmra.mrb[0].mxu0 %vm56_vm6, %v25_v17 }
 0x172   :  { %v134_v21 = vpop.permute.xlu1 %133 }
 0x173   :  { %v207_v25 = vadd.f32 %v206_v18, %v134_v21 }
 0x23c   :  { %v126_v22 = vpop.f32.mrb[0].mxu0 }
 0x23d   :  { %v127_v23 = vadd.f32 %v126_v22, %v54_v20  ;;  %v246_v24 = vpop.f32.mrb[1].mxu0 }
 0x23f   :  { %v130_v26 = vmax.f32 %v127_v23, 0.0 }
 0x241   :  { %v210_v27 = vadd.f32 %v207_v25, %v130_v26 }
 0x243   :  { %v211_v28 = vmax.f32 %v210_v27, 0.0 }
 0x245   :  { %213 = vst.msk [vmem:[#allocation2] sm:$0xff] %vm212_vm7, %v211_v28 }
 0x246   :  { %277 = shalt.err (!%p274_p4)
}
 0x247   :  { %s278_s6 = scalar_lea.hbm %s362_s5, 128 }
 0x248   :  { %p279_p5 = scmp.ne.s32.totalorder %s362_s5, %s278_s6  ;;  %p282_p6 = scmp.lt.u32.totalorder %s278_s6, %s362_s5 }
 0x24a   :  { %p284_p7 = pnand %p282_p6, %p279_p5 }
 0x24c   :  { %287 = shalt.err (!%p284_p7)
}
 0x24d   :  { %223 = dma.vmem_to_hbm [thread:$0]  %s221_s28, 128, %s362_s5, [#allocation3]  }
 0x24e   :  { %288 = dma.done.wait [#allocation3], 128  }
 0x24f   :  { %289 = vsyncadd [#allocation3], 4294967168 }
 0x250   :  { %227 = vsyncpa [#allocation3], 1 }

</bundles_post_ra>
